<compile_context>
chip_gen: v7x
topology: tpu7x:2x2x1
jax: 0.10.0
libtpu: 0.0.40
codegen_flags: <defaults>
</compile_context>

<pallas_src>
import functools

import jax
import jax.numpy as jnp
from jax.experimental import pallas as pl
from jax.experimental.pallas import tpu as pltpu


def _round_up(x, m):
    return ((x + m - 1) // m) * m


def _unigat_kernel(ns_src_ref, ns_nbr_ref, adj_ref, h_ref, o_ref, *,
                   alpha, ones_col, tk):
    """One (row-tile i, neighbor-tile k) grid step.

    ns_src_ref: (TM, 1)      f32   -(a[:, :F] . h[i]) for the row tile
    ns_nbr_ref: (1, TK)      f32   -(a[:, F:] . h[j]) for the neighbor tile
    adj_ref:    (TM, TK)     int8  {0,1} adjacency tile
    h_ref:      (NC, F_pad)  f32/bf16  full neighbor-feature slab (VMEM-resident),
                             col `ones_col` == 1
    o_ref:      (TM, F_pad)  f32   output block, resident across k (accumulator)
    """
    k = pl.program_id(1)

    @pl.when(k == 0)
    def _():
        o_ref[...] = jnp.zeros_like(o_ref)

    # Negated edge scores for this tile pair: pure broadcast add on the VPU.
    ns = ns_src_ref[...] + ns_nbr_ref[...]                    # (TM, TK) f32
    # -leakyrelu(score) == min(ns, alpha * ns) for 0 <= alpha <= 1
    # (saves a compare+select and the negate inside exp vs. the naive form).
    if 0.0 <= alpha <= 1.0:
        neg_lrelu = jnp.minimum(ns, alpha * ns)
    else:  # generic fallback outside the usual LeakyReLU slope range
        neg_lrelu = jnp.where(ns < 0, ns, alpha * ns)
    # TODO(synk): exp(-leakyrelu) is unguarded (matches the PyTorch layer);
    # an extremely negative score on a real edge overflows to inf.
    e = jnp.exp(neg_lrelu)
    edge_e = jnp.where(adj_ref[...] != 0, e, 0.0)             # zero on non-edges

    # One MXU matmul yields both the aggregated features (cols [:F]) and the
    # per-row edge sum (the ones column at `ones_col`).  The neighbor tile is
    # sliced from the VMEM-resident slab -> no per-row-tile HBM re-stream.
    start = pl.multiple_of(k * tk, tk)
    h_tile = h_ref[pl.ds(start, tk), :]
    o_ref[...] += jnp.dot(edge_e.astype(h_tile.dtype), h_tile,
                          preferred_element_type=jnp.float32)

    @pl.when(k == pl.num_programs(1) - 1)
    def _():
        acc = o_ref[...]
        rowsum = acc[:, ones_col:ones_col + 1]                # (TM, 1) e_rowsum
        # TODO(synk): rows with no edges give rowsum == 0 -> NaN, exactly like
        # the PyTorch layer; callers must guarantee non-empty rows (self loops).
        o_ref[...] = jnp.maximum(acc / rowsum, 0.0)           # exact div + relu


def sp_uniform_header_gat(h, adj, a, alpha=0.2, *, tm=512, tk=2048,
                          matmul_dtype=jnp.bfloat16):
    """UniGAT forward (concat=True, inference: dropout == identity).

    h:   (N, F)  f32 node features (the module applies no W).
    adj: (N, N)  adjacency mask, nonzero == edge.  Passing it already as int8
         avoids an extra N^2 cast pass in the wrapper.
    a:   (1, 2F) f32 attention parameter.
    matmul_dtype: MXU operand dtype.  bf16 is recommended on all generations
         (v5e/v6e/v7x MXUs are bf16-native); f32 for closest numerical parity.
    """
    N, F = h.shape
    f32 = jnp.float32

    # Hoisted + pre-negated score GEMVs (O(N*F), once, in plain JAX).
    ns_src = -(h.astype(f32) @ a[0, :F].astype(f32))[:, None]   # (N, 1)
    ns_nbr = -(h.astype(f32) @ a[0, F:].astype(f32))[None, :]   # (1, N)

    # ---- Tile sizes -------------------------------------------------------
    rows = _round_up(N, 32)                 # int8 sublane granularity (32,128)
    TM = min(tm, rows)
    if rows > 32 and rows // TM < 2:        # >=2 row tiles so the "parallel"
        TM = _round_up((rows + 1) // 2, 32)  # axis can shard across v7x's 2 TCs
    TK = min(tk, _round_up(N, 128))         # neighbor tile (lane-aligned)
    NR = _round_up(N, TM)                   # padded rows (aggregating nodes)
    NC = _round_up(N, TK)                   # padded cols (neighbors)
    F_pad = _round_up(F + 1, 128)           # lane-dense features + ones column
    ones_col = F

    # ---- Padded / packed inputs (padding is inert: adj == 0 there) ---------
    ns_src_p = jnp.zeros((NR, 1), f32).at[:N, :].set(ns_src)
    ns_nbr_p = jnp.zeros((1, NC), f32).at[:, :N].set(ns_nbr)

    # Adjacency streamed as int8; skip the wrapper-side N^2 pad/cast pass when
    # the caller already supplies it packed / aligned.
    if adj.dtype == jnp.int8 and adj.shape == (NR, NC):
        adj_p = adj
    else:
        adj_i8 = adj if adj.dtype == jnp.int8 else (adj != 0).astype(jnp.int8)
        if adj_i8.shape == (NR, NC):
            adj_p = adj_i8
        else:
            adj_p = jnp.zeros((NR, NC), jnp.int8).at[:N, :N].set(adj_i8)

    # Neighbor-feature slab: zero-padded, lane-dense, ones column appended so
    # e_rowsum rides the MXU matmul for free.  Held fully VMEM-resident.
    h_aug = jnp.zeros((NC, F_pad), matmul_dtype)
    h_aug = h_aug.at[:N, :F].set(h.astype(matmul_dtype))
    h_aug = h_aug.at[:, ones_col].set(1.0)

    # ---- VMEM budget (double-buffered blocks + resident h slab) ------------
    h_itemsize = jnp.dtype(matmul_dtype).itemsize
    vmem_est = (2 * TM * TK                      # adj tiles, int8
                + 2 * NC * F_pad * h_itemsize    # resident h slab
                + 2 * TM * F_pad * 4             # output block (f32)
                + 2 * (TM + TK) * 4)             # score vectors
    vmem_limit = int(min(max(vmem_est * 5 // 4, 16 * 1024 * 1024),
                         64 * 1024 * 1024))      # stay inside v7x's 64 MiB

    kernel = functools.partial(_unigat_kernel, alpha=float(alpha),
                               ones_col=ones_col, tk=TK)
    out_pad = pl.pallas_call(
        kernel,
        out_shape=jax.ShapeDtypeStruct((NR, F_pad), f32),
        grid_spec=pltpu.PrefetchScalarGridSpec(
            num_scalar_prefetch=0,
            grid=(NR // TM, NC // TK),
            in_specs=[
                pl.BlockSpec((TM, 1), lambda i, k: (i, 0)),        # -score src
                pl.BlockSpec((1, TK), lambda i, k: (0, k)),        # -score nbr
                pl.BlockSpec((TM, TK), lambda i, k: (i, k)),       # adj tile
                pl.BlockSpec((NC, F_pad), lambda i, k: (0, 0)),    # resident h
            ],
            out_specs=pl.BlockSpec((TM, F_pad), lambda i, k: (i, 0)),
        ),
        compiler_params=pltpu.CompilerParams(
            dimension_semantics=("parallel", "arbitrary"),
            vmem_limit_bytes=vmem_limit,
        ),
    )(ns_src_p, ns_nbr_p, adj_p, h_aug)

    return out_pad[:N, :F]


def _jax_reference(h, adj_dense, a, alpha=0.2):
    F = h.shape[1]
    s_src = h @ a[0, :F]
    s_nbr = h @ a[0, F:]
    scores = s_src[:, None] + s_nbr[None, :]
    lrelu = jnp.where(scores > 0, scores, alpha * scores)
    e = adj_dense * jnp.exp(-lrelu)
    e_rowsum = e.sum(axis=1, keepdims=True)
    h_prime = (e @ h) / e_rowsum
    return jnp.maximum(h_prime, 0.0)


if __name__ == "__main__":
    N, F = 200, 32          # N nodes (non-tile-multiple to exercise padding)
    alpha = 0.2

    key = jax.random.PRNGKey(0)
    k_h, k_a, k_adj = jax.random.split(key, 3)

    # Node features (already in out_features space — the module applies no W).
    h = jax.random.normal(k_h, (N, F), dtype=jnp.float32)

    # Attention parameter a: (1, 2F), xavier_uniform with gain=1.414.
    gain = 1.414
    fan_in, fan_out = 2 * F, 1
    bound = gain * jnp.sqrt(6.0 / (fan_in + fan_out))
    a = jax.random.uniform(k_a, (1, 2 * F), minval=-bound, maxval=bound,
                           dtype=jnp.float32)

    # Adjacency: random sparse-ish edges + self loops (every row non-empty,
    # matching the PyTorch code's implicit "no empty rows" requirement).
    # Built directly as int8 at the producer so the wrapper does no cast pass.
    adj_bool = (jax.random.uniform(k_adj, (N, N)) < 0.1) | jnp.eye(N, dtype=bool)
    adj_i8 = adj_bool.astype(jnp.int8)
    adj_f32 = adj_bool.astype(jnp.float32)   # reference only

    ref = _jax_reference(h, adj_f32, a, alpha=alpha)

    # Small tiles + f32 operands: exercises multi-tile accumulation, padding
    # and the parity path.
    out_f32 = sp_uniform_header_gat(h, adj_i8, a, alpha=alpha,
                                    tm=64, tk=128, matmul_dtype=jnp.float32)
    # Default tiles + bf16 operands: the recommended fast path (also exercises
    # the ">=2 row tiles" cap and the single-k-tile init/finalize fusion).
    out_bf16 = sp_uniform_header_gat(h, adj_i8, a, alpha=alpha)
    out_f32, out_bf16 = jax.block_until_ready((out_f32, out_bf16))

    assert out_f32.shape == (N, F) and out_bf16.shape == (N, F)
    assert not bool(jnp.isnan(out_f32).any())
    assert not bool(jnp.isnan(out_bf16).any())
    # f32 operands + exact divide: differences are only tile-sum ordering.
    assert bool(jnp.allclose(out_f32, ref, atol=1e-2, rtol=1e-2))
    # bf16 operands: relaxed tolerance for the reduced-precision MXU path.
    assert bool(jnp.allclose(out_bf16, ref, atol=5e-2, rtol=5e-2))

    print("KERNEL_OK")
</pallas_src>

<mosaic_0001>
module attributes {stable_mosaic.version = 11 : i64} {
  func.func @_unigat_kernel(%arg0: i32, %arg1: i32, %arg2: memref<64x1xf32, #tpu.memory_space<vmem>>, %arg3: memref<1x128xf32, #tpu.memory_space<vmem>>, %arg4: memref<64x128xi8, #tpu.memory_space<vmem>>, %arg5: memref<256x128xf32, #tpu.memory_space<vmem>>, %arg6: memref<64x128xf32, #tpu.memory_space<vmem>>) attributes {dimension_semantics = [#tpu.dimension_semantics<parallel>, #tpu.dimension_semantics<arbitrary>], iteration_bounds = array<i64: 4, 2>, scalar_prefetch = 0 : i64, scratch_operands = 0 : i64, tpu.core_type = #tpu.core_type<tc>, window_params = [{transform_indices = @transform_0, window_bounds = array<i64: 64, 1>}, {transform_indices = @transform_1, window_bounds = array<i64: 1, 128>}, {transform_indices = @transform_2, window_bounds = array<i64: 64, 128>}, {pipeline_mode = #tpu.pipeline_mode<synchronous>, transform_indices = @transform_3, window_bounds = array<i64: 256, 128>}, {transform_indices = @transform_4, window_bounds = array<i64: 64, 128>}]} {
    %c0_i32 = arith.constant 0 : i32
    %0 = arith.cmpi eq, %arg1, %c0_i32 : i32
    %1 = arith.extui %0 : i1 to i32
    %c0_i32_0 = arith.constant 0 : i32
    %2 = arith.cmpi ne, %1, %c0_i32_0 : i32
    scf.if %2 {
      %cst_14 = arith.constant 0.000000e+00 : f32
      %28 = vector.broadcast %cst_14 : f32 to vector<64x128xf32>
      %c0_15 = arith.constant 0 : index
      %c0_16 = arith.constant 0 : index
      %29 = vector.load %arg6[%c0_15, %c0_16] : memref<64x128xf32, #tpu.memory_space<vmem>>, vector<64x128xf32>
      tpu.vector_store %arg6[%c0_15, %c0_16], %28 {strides = array<i32>} : memref<64x128xf32, #tpu.memory_space<vmem>>, vector<64x128xf32>,
    } else {
    }
    %c0 = arith.constant 0 : index
    %c0_1 = arith.constant 0 : index
    %3 = vector.load %arg2[%c0, %c0_1] : memref<64x1xf32, #tpu.memory_space<vmem>>, vector<64x1xf32>
    %c0_2 = arith.constant 0 : index
    %c0_3 = arith.constant 0 : index
    %4 = vector.load %arg3[%c0_2, %c0_3] : memref<1x128xf32, #tpu.memory_space<vmem>>, vector<1x128xf32>
    %5 = vector.broadcast %3 : vector<64x1xf32> to vector<64x128xf32>
    %6 = vector.broadcast %4 : vector<1x128xf32> to vector<64x128xf32>
    %7 = arith.addf %5, %6 : vector<64x128xf32>
    %cst = arith.constant 2.000000e-01 : f32
    %8 = vector.broadcast %cst : f32 to vector<64x128xf32>
    %9 = arith.mulf %8, %7 : vector<64x128xf32>
    %10 = arith.minimumf %7, %9 : vector<64x128xf32>
    %11 = math.exp %10 : vector<64x128xf32>
    %c0_4 = arith.constant 0 : index
    %c0_5 = arith.constant 0 : index
    %12 = vector.load %arg4[%c0_4, %c0_5] : memref<64x128xi8, #tpu.memory_space<vmem>>, vector<64x128xi8>
    %c0_i8 = arith.constant 0 : i8
    %13 = vector.broadcast %c0_i8 : i8 to vector<64x128xi8>
    %14 = arith.cmpi ne, %12, %13 : vector<64x128xi8>
    %cst_6 = arith.constant 0.000000e+00 : f32
    %15 = vector.broadcast %cst_6 : f32 to vector<64x128xf32>
    %16 = arith.select %14, %11, %15 : vector<64x128xi1>, vector<64x128xf32>
    %c128_i32 = arith.constant 128 : i32
    %17 = arith.muli %arg1, %c128_i32 : i32
    %18 = tpu.assume_multiple %17, 128 : i32
    %19 = arith.index_cast %18 : i32 to index
    %c0_7 = arith.constant 0 : index
    %20 = vector.load %arg5[%19, %c0_7] : memref<256x128xf32, #tpu.memory_space<vmem>>, vector<128x128xf32>
    %c0_8 = arith.constant 0 : index
    %c0_9 = arith.constant 0 : index
    %21 = vector.load %arg6[%c0_8, %c0_9] : memref<64x128xf32, #tpu.memory_space<vmem>>, vector<64x128xf32>
    %cst_10 = arith.constant dense<0.000000e+00> : vector<64x128xf32>
    %22 = tpu.matmul %16, %20, %cst_10 {dimension_numbers = #tpu.dot_dimension_numbers<[1], [0], [0], [1], [0, 0, 1, 1], [], []>} : vector<64x128xf32>, vector<128x128xf32>, vector<64x128xf32> -> vector<64x128xf32>
    %23 = arith.addf %21, %22 : vector<64x128xf32>
    %c0_11 = arith.constant 0 : index
    %c0_12 = arith.constant 0 : index
    %24 = vector.load %arg6[%c0_11, %c0_12] : memref<64x128xf32, #tpu.memory_space<vmem>>, vector<64x128xf32>
    tpu.vector_store %arg6[%c0_11, %c0_12], %23 {strides = array<i32>} : memref<64x128xf32, #tpu.memory_space<vmem>>, vector<64x128xf32>,
    %c1_i32 = arith.constant 1 : i32
    %25 = arith.cmpi eq, %arg1, %c1_i32 : i32
    %26 = arith.extui %25 : i1 to i32
    %c0_i32_13 = arith.constant 0 : i32
    %27 = arith.cmpi ne, %26, %c0_i32_13 : i32
    scf.if %27 {
      %c0_14 = arith.constant 0 : index
      %c0_15 = arith.constant 0 : index
      %28 = vector.load %arg6[%c0_14, %c0_15] : memref<64x128xf32, #tpu.memory_space<vmem>>, vector<64x128xf32>
      %29 = vector.extract_strided_slice %28 {offsets = [0, 32], sizes = [64, 1], strides = [1, 1]} : vector<64x128xf32> to vector<64x1xf32>
      %30 = vector.broadcast %29 : vector<64x1xf32> to vector<64x128xf32>
      %31 = arith.divf %28, %30 : vector<64x128xf32>
      %cst_16 = arith.constant 0.000000e+00 : f32
      %32 = vector.broadcast %cst_16 : f32 to vector<64x128xf32>
      %33 = arith.maximumf %31, %32 : vector<64x128xf32>
      %c0_17 = arith.constant 0 : index
      %c0_18 = arith.constant 0 : index
      %34 = vector.load %arg6[%c0_17, %c0_18] : memref<64x128xf32, #tpu.memory_space<vmem>>, vector<64x128xf32>
      tpu.vector_store %arg6[%c0_17, %c0_18], %33 {strides = array<i32>} : memref<64x128xf32, #tpu.memory_space<vmem>>, vector<64x128xf32>,
    } else {
    }
    return
  }
  func.func @transform_0(%arg0: i32, %arg1: i32) -> (i32, i32) {
    %c0_i32 = arith.constant 0 : i32
    %c0_i32_0 = arith.constant 0 : i32
    return %arg0, %c0_i32 : i32, i32
  }
  func.func @transform_1(%arg0: i32, %arg1: i32) -> (i32, i32) {
    %c0_i32 = arith.constant 0 : i32
    %c0_i32_0 = arith.constant 0 : i32
    return %c0_i32, %arg1 : i32, i32
  }
  func.func @transform_2(%arg0: i32, %arg1: i32) -> (i32, i32) {
    %c0_i32 = arith.constant 0 : i32
    return %arg0, %arg1 : i32, i32
  }
  func.func @transform_3(%arg0: i32, %arg1: i32) -> (i32, i32) {
    %c0_i32 = arith.constant 0 : i32
    %c0_i32_0 = arith.constant 0 : i32
    %c0_i32_1 = arith.constant 0 : i32
    return %c0_i32, %c0_i32_0 : i32, i32
  }
  func.func @transform_4(%arg0: i32, %arg1: i32) -> (i32, i32) {
    %c0_i32 = arith.constant 0 : i32
    %c0_i32_0 = arith.constant 0 : i32
    return %arg0, %c0_i32 : i32, i32
  }
}

</mosaic_0001>

<bundles_post_ra>
// kernel: tpu_custom_call.1
= control target key start
LH: loop header
LB: loop body
LE: loop exit
PB: predicated region body
PF: predicated region fallthrough
CT: control target
= control target key end

     0   :  { %9 = vsyncpa [#allocation3], 0  ;;  %s1656_s0 = inlined_call_operand.vmem [shape: f32[256,1], index: 0, kind: input, shape index: {}]   ;;  %s1657_s1 = inlined_call_operand.vmem [shape: f32[1,256], index: 1, kind: input, shape index: {}]   ;;  %s1658_s2 = inlined_call_operand.hbm [shape: s8[256,256], index: 2, kind: input, shape index: {}]   ;;  %s1659_s3 = inlined_call_operand.vmem [shape: f32[256,128], index: 3, kind: input, shape index: {}]   ;;  %s1660_s4 = inlined_call_operand.hbm [shape: f32[256,128], index: 4, kind: output, shape index: {}]  }
   0x1   :  { %11 = vsyncpa [#allocation3 + $0x1], 0 }
   0x2   :  { %12 = vsyncpa [#allocation4], 0 }
   0x3   :  { %14 = vsyncpa [#allocation4 + $0x1], 0  ;;  %s1286_s15 = smov 0   ;;  %s1288_s16 = smov 0  }
   0x4   :  { %s1290_s17 = smov 0   ;;  %s1292_s18 = smov 0  }
   0x5   :  { %s1294_s19 = smov 0   ;;  %s1296_s20 = smov 0  }
   0x6   :  { %s1298_s21 = smov 0   ;;  %s1300_s22 = smov 0  }
   0x7   :  { %s1302_s23 = smov 0   ;;  %s1304_s24 = smov 0  }
   0x8   :  { %s1306_s25 = smov 0  }
   0x9 LB: > { %s803_s26 = sadd.s32 4294967295, %s1249_s25   ;;  %s804_s27 = sadd.s32 4294967294, %s1249_s25   ;;  %s1249_s25 = sphi %s1306_s25, %s20_s25   ;;  %s1245_s24 = sphi %s1304_s24, %s1696_s24   ;;  %s1241_s23 = sphi %s1302_s23, %s1695_s23   ;;  %s1237_s22 = sphi %s1300_s22, %s1694_s22   ;;  %s1233_s21 = sphi %s1298_s21, %s1693_s21   ;;  %s1229_s20 = sphi %s1296_s20, %s1692_s20   ;;  %s1225_s19 = sphi %s1294_s19, %s1691_s19   ;;  %s1221_s18 = sphi %s1292_s18, %s1690_s18   ;;  %s1217_s17 = sphi %s1290_s17, %s1689_s17   ;;  %s1213_s16 = sphi %s1288_s16, %s1688_s16   ;;  %s1209_s15 = sphi %s1286_s15, %s1687_s15  }
   0xa   : > { %s29_s28 = sadd.s32 1, %s1241_s23  ;;  %s32_s29 = sadd.s32 1, %s1245_s24 }
   0xb   : > { %p30_p0 = scmp.ge.s32.totalorder %s29_s28, 2  ;;  %s93_s30 = sadd.s32 1, %s1229_s20 }
   0xc   : > { %p100_p1 = scmp.ne.s32.totalorder %s1229_s20, %s1225_s19  ;;  %p101_p2 = scmp.eq.s32.totalorder %s1249_s25, 0 }
   0xd   : > { %s1698_s28 = smov (%p30_p0, %s29_s28), 0  ;;  %s1700_s29 = smov (!%p30_p0, %s32_s29), %s1245_s24 }
   0xe   : > { %1664 = sst [smem:[#allocation8_spill]] %s1698_s28  ;;  %s89_s5 = ssub.s32 %s1241_s23, %s1698_s28 }
   0xf   : > { %p1352_p3 = por %p101_p2, %p100_p1  ;;  %p34_p4 = scmp.ge.s32.totalorder %s1700_s29, 4 }
  0x10   : > { %p106_p5 = scmp.ne.s32.totalorder %s1225_s19, %s1221_s18  ;;  %p107_p6 = scmp.eq.s32.totalorder %s803_s26, 0 }
  0x11   : > { %s140_s7 = sadd.s32 1, %s1217_s17  ;;  %s1702_s29 = smov (%p34_p4, %s1700_s29), 0 }
  0x12   : > { %1666 = sst [smem:[#allocation9_spill]] %s1702_s29  ;;  %p1360_p7 = por %p107_p6, %p106_p5 }
  0x13   : > { %p150_p8 = scmp.ne.s32.totalorder %s1217_s17, %s1213_s16  ;;  %s88_s9 = ssub.s32 %s1245_s24, %s1702_s29 }
  0x14   : > { %p151_p9 = scmp.eq.s32.totalorder %s803_s26, 7  ;;  %s90_s10 = sor.u32 %s89_s5, %s88_s9 }
  0x15   : > { %p138_p10 = scmp.eq.s32.totalorder %s88_s9, 0  ;;  %p91_p11 = scmp.eq.s32.totalorder %s90_s10, 0 }
  0x16   : > { %p1368_p12 = por %p151_p9, %p150_p8  ;;  %p156_p13 = scmp.ne.s32.totalorder %s1213_s16, %s1209_s15 }
  0x17   : > { %s1373_s12 = scalar_select %p138_p10, %s1217_s17, %s140_s7  }
  0x18   : > { %s1668_s11 = scalar_select %p1368_p12, 1, 0 }
  0x19   : > { %1669 = sst [smem:[#allocation10_spill]] %s1373_s12  ;;  %p157_p0 = scmp.eq.s32.totalorder %s804_s27, 7 }
  0x1a   : > { %s1376_s13 = scalar_select %p91_p11, %s1229_s20, %s93_s30  }
  0x1b   : > { %p963_p1 = scmp.lt.s32.totalorder %s1249_s25, 8  ;;  %p1381_p2 = por %p157_p0, %p156_p13 }
  0x1c   : > { %s195_s18 = sand.u32 1, %s1229_s20   ;;  %s833_s5 = sshll.u32 %s1245_s24, 2 }
  0x1d   : > { %s1670_s14 = scalar_select %p1381_p2, 1, 0 }
  0x1e   : > { %s807_s26 = sshll.u32 %s195_s18, 4  ;;  %s205_s9 = sadd.s32 %s1241_s23, %s833_s5 }
  0x1f   : > { %s199_s10 = scalar_lea.vmem [#allocation2], %s807_s26  ;;  %s810_s28 = sshll.u32 %s205_s9, 7 }
  0x20   : > { %s208_s29 = sshll.u32 %s199_s10, 4  ;;  %s1393_s30 = scalar_lea.hbm %s1658_s2, %s810_s28  ;;  %s1388_s29 = int_to_ptr.vmem [resolvable:$true] %s208_s29 }
  0x21   : > { %p1397_p4 = pnand %p963_p1, %p1352_p3  ;;  %s1401_s26 = scalar_lea.sflag [#allocation3], %s195_s18 }
  0x22   : > { %s1097_s5 = scalar_lea.hbm %s1393_s30, 256  ;;  %s1102_s12 = scalar_lea.hbm %s1658_s2, 2048 }
  0x23   : > { %p1098_p5 = scmp.ne.s32.totalorder %s1393_s30, %s1097_s5  ;;  %p1099_p6 = pneg %p1397_p4 }
  0x24   : > { %p1103_p3 = scmp.lt.u32.totalorder %s1393_s30, %s1658_s2  ;;  %p1104_p10 = scmp.lt.u32.totalorder %s1102_s12, %s1097_s5 }
  0x25   : > { %p1100_p8 = pnand %p1099_p6, %p1098_p5  ;;  %p1106_p13 = scmp.lt.u32.totalorder %s1097_s5, %s1393_s30 }
  0x26   : > { %p1105_p11 = por %p1104_p10, %p1103_p3 }
  0x27   : > { %p1101_p9 = pneg %p1100_p8 }
  0x28   : > { %p1107_p0 = por %p1106_p13, %p1105_p11 }
  0x2a   : > { %p1108_p1 = pnand %p1107_p0, %p1101_p9 }
  0x2c   : > { %1111 = shalt.err (!%p1108_p1)
}
  0x2d   : > { %s1112_s18 = scalar_lea.vmem %s1388_s29, 256  ;;  %s1251_s7 = smov [#allocation2]  }
  0x2e   : > { %p1113_p5 = scmp.ne.s32.totalorder %s1388_s29, %s1112_s18  ;;  %s1117_s28 = sshll.u32 %s1251_s7, 4  ;;  %s1118_s28 = int_to_ptr.vmem [resolvable:$false] %s1117_s28 }
  0x2f   : > { %s1119_s6 = scalar_lea.vmem %s1118_s28, 512  ;;  %p1120_p12 = scmp.lt.s32.totalorder %s1388_s29, %s1118_s28 }
  0x30   : > { %p1115_p8 = pnand %p1113_p5, %p1099_p6  ;;  %p1121_p3 = scmp.lt.s32.totalorder %s1119_s6, %s1112_s18 }
  0x32   : > { %p1116_p2 = pneg %p1115_p8  ;;  %p1122_p10 = por %p1121_p3, %p1120_p12 }
  0x34   : > { %p1123_p11 = pnand %p1122_p10, %p1116_p2 }
  0x36   : > { %1126 = shalt.err (!%p1123_p11)
}
  0x37   : > { %s1252_s5 = smov 256   ;;  %s1253_s12 = smov 128  }
  0x38   : > { %s1254_s9 = smov 8   ;;  %p811_p6 = scmp.ge.s32.totalorder %s1249_s25, 1 }
  0x39   : > { %958 = dma.hbm_to_vmem [thread:$0]  (!%p1397_p4), %s1393_s30, 256, %s1388_s29, %s1401_s26, %s1252_s5, %s1253_s12, %s1254_s9  }
  0x3a   : > { %p216_p9 = scmp.lt.s32.totalorder %s1249_s25, 9 }
  0x3c   : > { %p217_p13 = pnand %p811_p6, %p216_p9 }
  0x3d   : > { %s222_s10 = sand.u32 (!%p217_p13), 1, %s1225_s19  }
  0x3e   : > { %220 = sbr.rel (%p217_p13) target bundleno = 650 (0x28a), region = 36  ;;  %s1432_s18 = sshll.u32 (!%p217_p13), %s222_s10, 4 }
  0x3f   : > { %s223_s7 = scalar_lea.sflag (!%p217_p13), [#allocation3], %s222_s10 }
  0x45   : > { %1200 = dma.done.wait (%p1360_p7), %s223_s7, 256  }
  0x46   : > { %1202 = vsyncadd (%p1360_p7), %s223_s7, 4294967040  ;;  %s256_s29 = sand.u32 1, %s1213_s16   ;;  %s814_s30 = sshll.u32 %s1237_s22, 3 }
  0x47   : > { %s813_s27 = sshll.u32 %s256_s29, 6  ;;  %p260_p12 = scmp.lt.s32.totalorder %s814_s30, 31 }
  0x48   : > { %p265_p2 = scmp.lt.s32.totalorder %s1233_s21, 1  ;;  %s1456_s28 = scalar_lea.vmem [#allocation5], %s813_s27 }
  0x49   : > { %s1704_s30 = smov (!%p260_p12, %s814_s30), 31  ;;  %p816_p7 = scmp.ne.s32.totalorder %s1233_s21, 0 }
  0x4a   : > { %s1445_s26 = scalar_select %p265_p2, %s1233_s21, 1 }
  0x4b   : > { %s815_s6 = sshll.u32 %s1704_s30, 3  ;;  %275 = sbr.rel (%p816_p7) target bundleno = 82 (0x52), region = 44  ;;  %v1255_v0 = vmov (!%p816_p7), 0.0  }
  0x4c   : > { %s1450_s8 = scalar_lea.vmem %s1656_s0, %s815_s6  ;;  %s267_s7 = scalar_lea.vmem %s1657_s1, %s1445_s26  ;;  %276 = vst [vmem:[%s1456_s28] sm:$0xff] (!%p816_p7), %v1255_v0  ;;  %277 = vst [vmem:[%s1456_s28 + $0x8] sm:$0xff] (!%p816_p7), %v1255_v0 }
  0x4d   : > { %278 = vst [vmem:[%s1456_s28 + $0x10] sm:$0xff] (!%p816_p7), %v1255_v0  ;;  %279 = vst [vmem:[%s1456_s28 + $0x18] sm:$0xff] (!%p816_p7), %v1255_v0 }
  0x4e   : > { %280 = vst [vmem:[%s1456_s28 + $0x20] sm:$0xff] (!%p816_p7), %v1255_v0  ;;  %281 = vst [vmem:[%s1456_s28 + $0x28] sm:$0xff] (!%p816_p7), %v1255_v0 }
  0x4f   : > { %282 = vst [vmem:[%s1456_s28 + $0x30] sm:$0xff] (!%p816_p7), %v1255_v0  ;;  %283 = vst [vmem:[%s1456_s28 + $0x38] sm:$0xff] (!%p816_p7), %v1255_v0 }
  0x52 PF: > { %v285_v1 = vld [vmem:[%s1450_s8 + $0x8] sm:$0xff]  ;;  %v284_v2 = vld [vmem:[%s1450_s8] sm:$0xff]  ;;  %s818_s30 = sshll.u32 %s1233_s21, 7  ;;  %v1256_v3 = vmov 0   ;;  %v290_v14 = vld [vmem:[%s1450_s8 + $0x30] sm:$0xff]  ;;  %s1672_s12 = scalar_lea.vmem [#allocation2], %s1432_s18 }
  0x53   : > { %1062 = vset.pattern.permute.xlu1 %v1256_v3  ;;  %1061 = vset.pattern.permute.xlu0 %v1256_v3  ;;  %s1475_s5 = scalar_lea.vmem %s1659_s3, %s818_s30  ;;  %v289_v4 = vld [vmem:[%s1450_s8 + $0x28] sm:$0xff]  ;;  %v288_v5 = vld [vmem:[%s1450_s8 + $0x20] sm:$0xff]  ;;  %v286_v15 = vld [vmem:[%s1450_s8 + $0x10] sm:$0xff]  ;;  %p827_p4 = scmp.ne.s32.totalorder %s1233_s21, 1 }
  0x54   : > { %300 = vperm.xlu1 %1062, %v285_v1   ;;  %295 = vperm.xlu0 %1061, %v284_v2   ;;  %v451_v6 = vld [vmem:[%s1475_s5] sm:$0xff]  ;;  %v452_v7 = vld [vmem:[%s1475_s5 + $0x8] sm:$0xff]  ;;  %v453_v8 = vld [vmem:[%s1475_s5 + $0x10] sm:$0xff] }
  0x55   : > { %v454_v9 = vld [vmem:[%s1475_s5 + $0x18] sm:$0xff]  ;;  %v903_v10 = vpack.c.bf16 %v452_v7, %v451_v6  ;;  %v455_v12 = vld [vmem:[%s1475_s5 + $0x20] sm:$0xff]  ;;  %v456_v13 = vld [vmem:[%s1475_s5 + $0x28] sm:$0xff] }
  0x56   : > { %v907_v11 = vpack.c.bf16 %v454_v9, %v453_v8  ;;  %v911_v16 = vpack.c.bf16 %v456_v13, %v455_v12  ;;  %v457_v17 = vld [vmem:[%s1475_s5 + $0x30] sm:$0xff]  ;;  %v458_v18 = vld [vmem:[%s1475_s5 + $0x38] sm:$0xff]  ;;  %v459_v22 = vld [vmem:[%s1475_s5 + $0x40] sm:$0xff] }
  0x57   : > { %904 = vmatprep.subr.bf16.mxu0 %v903_v10  ;;  %935 = vmatprep.subr.bf16.mxu1 %v903_v10  ;;  %v291_v19 = vld [vmem:[%s1450_s8 + $0x38] sm:$0xff]  ;;  %v915_v21 = vpack.c.bf16 %v458_v18, %v457_v17  ;;  %v460_v23 = vld [vmem:[%s1475_s5 + $0x48] sm:$0xff]  ;;  %v461_v25 = vld [vmem:[%s1475_s5 + $0x50] sm:$0xff] }
  0x58   : > { %320 = vperm.xlu1 %1062, %v289_v4   ;;  %315 = vperm.xlu0 %1061, %v288_v5   ;;  %v287_v20 = vld [vmem:[%s1450_s8 + $0x18] sm:$0xff]  ;;  %v919_v24 = vpack.c.bf16 %v460_v23, %v459_v22  ;;  %v463_v28 = vld [vmem:[%s1475_s5 + $0x60] sm:$0xff]  ;;  %v464_v29 = vld [vmem:[%s1475_s5 + $0x68] sm:$0xff]  ;;  %s1673_s8 = smov %s1672_s12 }
  0x59   : > { %906 = vmatpush3.bf16.msra.mxu0 %v903_v10  ;;  %943 = vmatpush3.bf16.msra.mxu1 %v903_v10  ;;  %v462_v26 = vld [vmem:[%s1475_s5 + $0x58] sm:$0xff]  ;;  %v927_v30 = vpack.c.bf16 %v464_v29, %v463_v28  ;;  %v465_v31 = vld [vmem:[%s1475_s5 + $0x70] sm:$0xff]  ;;  %v380_v38 = vld [vmem:[%s1673_s8 + $0x8] sm:$0xff] }
  0x5a   : > { %908 = vmatprep.subr.bf16.mxu0 %v907_v11  ;;  %936 = vmatprep.subr.bf16.mxu1 %v907_v11  ;;  %v923_v27 = vpack.c.bf16 %v462_v26, %v461_v25  ;;  %v466_v32 = vld [vmem:[%s1475_s5 + $0x78] sm:$0xff]  ;;  %v379_v34 = vld [vmem:[%s1672_s12] sm:$0xff]  ;;  %vm382_vm1 = vnez %v380_v38 }
  0x5b   : > { %v931_v33 = vpack.c.bf16 %v466_v32, %v465_v31  ;;  %vm381_vm0 = vnez %v379_v34  ;;  %v384_v42 = vsel %vm382_vm1, 16843009, %v1256_v3  ;;  %v817_v44 = vld [vmem:[%s267_s7] ss:$0 sm:$0xff] }
  0x5c   : > { %325 = vperm.xlu1 %1062, %v290_v14   ;;  %305 = vperm.xlu0 %1061, %v286_v15   ;;  %v1502_v35 = vsel %vm381_vm0, 16843009, %v1256_v3  ;;  %v389_v45 = vunpack.c.0.s8 %v384_v42  ;;  %v390_v48 = vunpack.c.1.s8 %v384_v42  ;;  %v391_v53 = vunpack.c.2.s8 %v384_v42 }
  0x5d   : > { %910 = vmatpush3.bf16.msra.mxu0 %v907_v11  ;;  %944 = vmatpush3.bf16.msra.mxu1 %v907_v11  ;;  %v385_v36 = vunpack.c.0.s8 %v1502_v35  ;;  %v386_v37 = vunpack.c.1.s8 %v1502_v35  ;;  %v387_v60 = vunpack.c.2.s8 %v1502_v35  ;;  %v392_v9 = vunpack.c.3.s8 %v384_v42 }
  0x5e   : > { %912 = vmatprep.subr.bf16.mxu0 %v911_v16  ;;  %937 = vmatprep.subr.bf16.mxu1 %v911_v16  ;;  %v401_v52 = vpack.c.b16 %v389_v45, %v389_v45  ;;  %v403_v59 = vpack.c.b16 %v390_v48, %v390_v48  ;;  %v405_v5 = vpack.c.b16 %v391_v53, %v391_v53  ;;  %v388_v15 = vunpack.c.3.s8 %v1502_v35 }
  0x5f   : > { %v393_v39 = vpack.c.b16 %v385_v36, %v385_v36  ;;  %v395_v40 = vpack.c.b16 %v386_v37, %v386_v37  ;;  %v397_v14 = vpack.c.b16 %v387_v60, %v387_v60  ;;  %v407_v25 = vpack.c.b16 %v392_v9, %v392_v9 }
  0x60   : > { %330 = vperm.xlu1 %1062, %v291_v19   ;;  %310 = vperm.xlu0 %1061, %v287_v20   ;;  %v402_v4 = vpack.c.b8 %v401_v52, %v401_v52  ;;  %v404_v13 = vpack.c.b8 %v403_v59, %v403_v59  ;;  %v399_v31 = vpack.c.b16 %v388_v15, %v388_v15  ;;  %v469_v20 = vld [vmem:[%s1456_s28 + $0x10] sm:$0xff] }
  0x61   : > { %914 = vmatpush3.bf16.msra.mxu0 %v911_v16  ;;  %945 = vmatpush3.bf16.msra.mxu1 %v911_v16  ;;  %v394_v41 = vpack.c.b8 %v393_v39, %v393_v39  ;;  %v396_v43 = vpack.c.b8 %v395_v40, %v395_v40 }
  0x62   : > { %916 = vmatprep.subr.bf16.mxu0 %v915_v21  ;;  %938 = vmatprep.subr.bf16.mxu1 %v915_v21  ;;  %vm1521_vm4 = vnez %v402_v4  ;;  %vm1525_vm5 = vnez %v404_v13  ;;  %v400_v45 = vpack.c.b8 %v399_v31, %v399_v31  ;;  %v468_v4 = vld [vmem:[%s1456_s28 + $0x8] sm:$0xff] }
  0x63   : > { %vm409_vm2 = vnez %v394_v41  ;;  %vm410_vm3 = vnez %v396_v43  ;;  %v421_v36 = vsel %vm1521_vm4, 16843009, %v1256_v3  ;;  %v408_v41 = vpack.c.b8 %v407_v25, %v407_v25 }
  0x64   : > { %v1515_v51 = vsel %vm409_vm2, 16843009, %v1256_v3  ;;  %v418_v56 = vsel %vm410_vm3, 16843009, %v1256_v3  ;;  %v422_v43 = vsel %vm1525_vm5, 16843009, %v1256_v3  ;;  %v429_v48 = vunpack.c.0.s8 %v421_v36 }
  0x65   : > { %918 = vmatpush3.bf16.msra.mxu0 %v915_v21  ;;  %946 = vmatpush3.bf16.msra.mxu1 %v915_v21  ;;  %v425_v1 = vunpack.c.0.s8 %v1515_v51  ;;  %v426_v2 = vunpack.c.0.s8 %v418_v56  ;;  %v406_v21 = vpack.c.b8 %v405_v5, %v405_v5  ;;  %v430_v52 = vunpack.c.0.s8 %v422_v43  ;;  %v467_v5 = vld [vmem:[%s1456_s28] sm:$0xff] }
  0x66   : > { %920 = vmatprep.subr.bf16.mxu0 %v919_v24  ;;  %939 = vmatprep.subr.bf16.mxu1 %v919_v24  ;;  %vm416_vm10 = vnez %v408_v41  ;;  %vm412_vm11 = vnez %v400_v45  ;;  %vm437_vm12 = vcmp.ne.s32.totalorder %v429_v48, 0 }
  0x67   : > { %vm1532_vm6 = vnez %v406_v21  ;;  %vm433_vm8 = vcmp.ne.s32.totalorder %v425_v1, 0  ;;  %vm1539_vm9 = vcmp.ne.s32.totalorder %v426_v2, 0  ;;  %vm438_vm13 = vcmp.ne.s32.totalorder %v430_v52, 0 }
  0x68   : > { %v420_v60 = vsel %vm412_vm11, 16843009, %v1256_v3 }
  0x69   : > { %922 = vmatpush3.bf16.msra.mxu0 %v919_v24  ;;  %947 = vmatpush3.bf16.msra.mxu1 %v919_v24 }
  0x6a   : > { %924 = vmatprep.subr.bf16.mxu0 %v923_v27  ;;  %940 = vmatprep.subr.bf16.mxu1 %v923_v27 }
  0x6d   : > { %926 = vmatpush3.bf16.msra.mxu0 %v923_v27  ;;  %948 = vmatpush3.bf16.msra.mxu1 %v923_v27 }
  0x6e   : > { %928 = vmatprep.subr.bf16.mxu0 %v927_v30  ;;  %941 = vmatprep.subr.bf16.mxu1 %v927_v30 }
  0x71   : > { %930 = vmatpush3.bf16.msra.mxu0 %v927_v30  ;;  %949 = vmatpush3.bf16.msra.mxu1 %v927_v30  ;;  %v398_v30 = vpack.c.b8 %v397_v14, %v397_v14 }
  0x72   : > { %932 = vmatprep.subr.bf16.mxu0 %v931_v33  ;;  %942 = vmatprep.subr.bf16.mxu1 %v931_v33 }
  0x73   : > { %vm411_vm7 = vnez %v398_v30  ;;  %v1257_v30 = vmov (!%p827_p4), 32  }
  0x74   : > { %v419_v53 = vsel %vm411_vm7, 16843009, %v1256_v3  ;;  %1080 = vset.pattern.permute.xlu1 (!%p827_p4), %v1257_v30  ;;  %1079 = vset.pattern.permute.xlu0 (!%p827_p4), %v1257_v30 }
  0x75   : > { %934 = vmatpush3.bf16.msra.mxu0 %v931_v33  ;;  %950 = vmatpush3.bf16.msra.mxu1 %v931_v33 }
  0xd3   : > { %v301_v46 = vpop.permute.xlu1 %300  ;;  %v296_v47 = vpop.permute.xlu0 %295 }
  0xd4   : > { %v340_v49 = vadd.f32 %v817_v44, %v301_v46  ;;  %v339_v50 = vadd.f32 %v817_v44, %v296_v47 }
  0xd6   : > { %v348_v54 = vmul.f32 0.2, %v340_v49  ;;  %v347_v55 = vmul.f32 0.2, %v339_v50 }
  0xd7   : > { %v321_v57 = vpop.permute.xlu1 %320  ;;  %v316_v58 = vpop.permute.xlu0 %315 }
  0xd8   : > { %v356_v61 = vmin.f32 %v340_v49, %v348_v54  ;;  %v355_v62 = vmin.f32 %v339_v50, %v347_v55  ;;  %v344_v63 = vadd.f32 %v817_v44, %v321_v57  ;;  %v343_v0 = vadd.f32 %v817_v44, %v316_v58 }
  0xd9   : > { %v423_v49 = vsel %vm1532_vm6, 16843009, %v1256_v3  ;;  %v427_v57 = vunpack.c.0.s8 %v419_v53  ;;  %v424_v58 = vsel %vm416_vm10, 16843009, %v1256_v3 }
  0xda   : > { %v365_v6 = vmul.f32 1.442695, %v356_v61  ;;  %v363_v7 = vmul.f32 1.442695, %v355_v62  ;;  %v352_v8 = vmul.f32 0.2, %v344_v63  ;;  %v431_v56 = vunpack.c.0.s8 %v423_v49 }
  0xdb   : > { %v351_v10 = vmul.f32 0.2, %v343_v0  ;;  %v326_v11 = vpop.permute.xlu1 %325  ;;  %v306_v12 = vpop.permute.xlu0 %305  ;;  %v432_v62 = vunpack.c.0.s8 %v424_v58  ;;  %vm435_vm15 = vcmp.ne.s32.totalorder %v427_v57, 0 }
  0xdc   : > { %1063 = vpow2.f32 %v365_v6  ;;  %v360_v16 = vmin.f32 %v344_v63, %v352_v8  ;;  %v345_v17 = vadd.f32 %v817_v44, %v326_v11  ;;  %v341_v18 = vadd.f32 %v817_v44, %v306_v12  ;;  %v471_v11 = vld [vmem:[%s1456_s28 + $0x20] sm:$0xff] }
  0xdd   : > { %1065 = vpow2.f32 %v363_v7  ;;  %v359_v19 = vmin.f32 %v343_v0, %v351_v10  ;;  %vm439_vm14 = vcmp.ne.s32.totalorder %v431_v56, 0  ;;  %v428_v63 = vunpack.c.0.s8 %v420_v60  ;;  %v472_v10 = vld [vmem:[%s1456_s28 + $0x28] sm:$0xff] }
  0xde   : > { %v373_v22 = vmul.f32 1.442695, %v360_v16  ;;  %v353_v23 = vmul.f32 0.2, %v345_v17  ;;  %v349_v24 = vmul.f32 0.2, %v341_v18 }
  0xdf   : > { %v371_v26 = vmul.f32 1.442695, %v359_v19  ;;  %v331_v27 = vpop.permute.xlu1 %330  ;;  %v311_v28 = vpop.permute.xlu0 %310  ;;  %vm440_vm0 = vcmp.ne.s32.totalorder %v432_v62, 0  ;;  %vm436_vm1 = vcmp.ne.s32.totalorder %v428_v63, 0  ;;  %v474_v16 = vld [vmem:[%s1456_s28 + $0x38] sm:$0xff] }
  0xe0   : > { %1067 = vpow2.f32 %v373_v22  ;;  %v361_v32 = vmin.f32 %v345_v17, %v353_v23  ;;  %v357_v33 = vmin.f32 %v341_v18, %v349_v24  ;;  %v346_v34 = vadd.f32 %v817_v44, %v331_v27  ;;  %v470_v17 = vld [vmem:[%s1456_s28 + $0x18] sm:$0xff]  ;;  %v473_v18 = vld [vmem:[%s1456_s28 + $0x30] sm:$0xff] }
  0xe1   : > { %1069 = vpow2.f32 %v371_v26  ;;  %v342_v35 = vadd.f32 %v817_v44, %v311_v28 }
  0xe2   : > { %v375_v38 = vmul.f32 1.442695, %v361_v32  ;;  %v367_v39 = vmul.f32 1.442695, %v357_v33  ;;  %v354_v40 = vmul.f32 0.2, %v346_v34 }
  0xe3   : > { %v350_v42 = vmul.f32 0.2, %v342_v35 }
  0xe4   : > { %1071 = vpow2.f32 %v375_v38  ;;  %v362_v44 = vmin.f32 %v346_v34, %v354_v40 }
  0xe5   : > { %1073 = vpow2.f32 %v367_v39  ;;  %v358_v47 = vmin.f32 %v342_v35, %v350_v42 }
  0xe6   : > { %v1064_v50 = vpop.eup %1063  ;;  %v377_v51 = vmul.f32 1.442695, %v362_v44 }
  0xe7   : > { %v1066_v54 = vpop.eup %1065  ;;  %v369_v55 = vmul.f32 1.442695, %v358_v47 }
  0xe8   : > { %1075 = vpow2.f32 %v377_v51  ;;  %891 = vmatprep.mubr.msk.f32.mxu0 %vm433_vm8, %v1066_v54 }
  0xe9   : > { %1077 = vpow2.f32 %v369_v55  ;;  %892 = vmatmul.mubr.msk.f32.vlgmr.msra.gmra.mrb[0].mxu0 %vm1539_vm9, %v1064_v50 }
  0xea   : > { %v1068_v59 = vpop.eup %1067 }
  0xeb   : > { %v1070_v61 = vpop.eup %1069 }
  0xec   : > { %897 = vmatprep.mubr.msk.f32.mxu1 %vm437_vm12, %v1070_v61 }
  0xed   : > { %898 = vmatmul.mubr.msk.f32.vlgmr.msra.gmra.mrb[0].mxu1 %vm438_vm13, %v1068_v59 }
  0xee   : > { %v1072_v0 = vpop.eup %1071 }
  0xef   : > { %v1074_v1 = vpop.eup %1073  ;;  %900 = vmatprep.mubr.msk.f32.mxu1 %vm439_vm14, %v1072_v0 }
  0xf0   : > { %894 = vmatprep.mubr.msk.f32.mxu0 %vm435_vm15, %v1074_v1 }
  0xf2   : > { %v1076_v3 = vpop.eup %1075 }
  0xf3   : > { %v1078_v2 = vpop.eup %1077  ;;  %901 = vmatmul.mubr.msk.f32.gmra.mrb[2].mxu1 %vm440_vm0, %v1076_v3 }
  0xf4   : > { %895 = vmatmul.mubr.msk.f32.gmra.mrb[2].mxu0 %vm436_vm1, %v1078_v2 }
 0x1bc   : > { %v893_v6 = vpop.f32.mrb[0].mxu0 }
 0x1bd   : > { %v581_v7 = vadd.f32 %v893_v6, %v468_v4  ;;  %v541_v8 = vpop.f32.mrb[1].mxu0 }
 0x1be   : > { %v580_v9 = vadd.f32 %v541_v8, %v467_v5 }
 0x1bf   : > { %589 = vst [vmem:[%s1456_s28 + $0x8] sm:$0xff] %v581_v7 }
 0x1c0   : > { %588 = vst [vmem:[%s1456_s28] sm:$0xff] %v580_v9  ;;  %v899_v12 = vpop.f32.mrb[0].mxu1 }
 0x1c1   : > { %v585_v13 = vadd.f32 %v899_v12, %v472_v10  ;;  %v561_v14 = vpop.f32.mrb[1].mxu1 }
 0x1c2   : > { %v584_v15 = vadd.f32 %v561_v14, %v471_v11 }
 0x1c3   : > { %593 = vst [vmem:[%s1456_s28 + $0x28] sm:$0xff] %v585_v13 }
 0x1c4   : > { %592 = vst [vmem:[%s1456_s28 + $0x20] sm:$0xff] %v584_v15 }
 0x1c5   : > { %599 = sbr.rel (%p827_p4) target bundleno = 624 (0x270), region = 48 }
 0x1c6   : > { %v902_v19 = vpop.f32.mrb[2].mxu1  ;;  %v601_v32 = vld [vmem:[%s1456_s28 + $0x8] sm:$0xff] (!%p827_p4) }
 0x1c7   : > { %v896_v21 = vpop.f32.mrb[2].mxu0  ;;  %v587_v22 = vadd.f32 %v902_v19, %v474_v16  ;;  %v571_v23 = vpop.f32.mrb[3].mxu1  ;;  %v600_v29 = vld [vmem:[%s1456_s28] sm:$0xff] (!%p827_p4) }
 0x1c8   : > { %v583_v24 = vadd.f32 %v896_v21, %v470_v17  ;;  %v551_v25 = vpop.f32.mrb[3].mxu0  ;;  %v586_v26 = vadd.f32 %v571_v23, %v473_v18  ;;  %610 = vperm.xlu0 (!%p827_p4), %1079, %v600_v29  }
 0x1c9   : > { %595 = vst [vmem:[%s1456_s28 + $0x38] sm:$0xff] %v587_v22  ;;  %v582_v27 = vadd.f32 %v551_v25, %v469_v20 }
 0x1ca   : > { %591 = vst [vmem:[%s1456_s28 + $0x18] sm:$0xff] %v583_v24  ;;  %594 = vst [vmem:[%s1456_s28 + $0x30] sm:$0xff] %v586_v26  ;;  %v605_v33 = vld [vmem:[%s1456_s28 + $0x28] sm:$0xff] (!%p827_p4) }
 0x1cb   : > { %590 = vst [vmem:[%s1456_s28 + $0x10] sm:$0xff] %v582_v27  ;;  %v604_v34 = vld [vmem:[%s1456_s28 + $0x20] sm:$0xff] (!%p827_p4) }
 0x1cc   : > { %615 = vperm.xlu0 %1079, %v601_v32  }
 0x1d0   : > { %630 = vperm.xlu0 %1079, %v604_v34   ;;  %v607_v35 = vld [vmem:[%s1456_s28 + $0x38] sm:$0xff] }
 0x1d1   : > { %v603_v31 = vld [vmem:[%s1456_s28 + $0x18] sm:$0xff]  ;;  %v606_v36 = vld [vmem:[%s1456_s28 + $0x30] sm:$0xff] }
 0x1d2   : > { %v602_v28 = vld [vmem:[%s1456_s28 + $0x10] sm:$0xff] }
 0x1d3   : > { %620 = vperm.xlu1 %1080, %v602_v28  }
 0x1d4   : > { %640 = vperm.xlu0 %1079, %v606_v36  }
 0x1d7   : > { %625 = vperm.xlu1 %1080, %v603_v31  }
 0x1db   : > { %635 = vperm.xlu1 %1080, %v605_v33  }
 0x1df   : > { %645 = vperm.xlu1 %1080, %v607_v35  }
 0x247   : > { %v611_v38 = vpop.permute.xlu0 %610 }
 0x24b   : > { %v616_v40 = vpop.permute.xlu0 %615 }
 0x24f   : > { %v631_v42 = vpop.permute.xlu0 %630 }
 0x252   : > { %v621_v37 = vpop.permute.xlu1 %620 }
 0x253   : > { %1081 = vrcp.f32 %v621_v37  ;;  %v641_v47 = vpop.permute.xlu0 %640 }
 0x254   : > { %1083 = vrcp.f32 %v611_v38 }
 0x256   : > { %v626_v39 = vpop.permute.xlu1 %625 }
 0x257   : > { %1085 = vrcp.f32 %v626_v39 }
 0x258   : > { %1087 = vrcp.f32 %v616_v40 }
 0x25a   : > { %v636_v41 = vpop.permute.xlu1 %635 }
 0x25b   : > { %1089 = vrcp.f32 %v636_v41 }
 0x25c   : > { %1091 = vrcp.f32 %v631_v42 }
 0x25d   : > { %v1082_v43 = vpop.eup %1081 }
 0x25e   : > { %v1084_v45 = vpop.eup %1083  ;;  %v653_v44 = vmul.f32 %v1082_v43, %v602_v28  ;;  %v646_v46 = vpop.permute.xlu1 %645 }
 0x25f   : > { %v649_v48 = vmul.f32 %v1084_v45, %v600_v29  ;;  %1093 = vrcp.f32 %v646_v46 }
 0x260   : > { %v666_v49 = vmax.f32 %v653_v44, 0.0  ;;  %1095 = vrcp.f32 %v641_v47 }
 0x261   : > { %v1086_v50 = vpop.eup %1085  ;;  %v664_v51 = vmax.f32 %v649_v48, 0.0 }
 0x262   : > { %v1088_v52 = vpop.eup %1087  ;;  %674 = vst [vmem:[%s1456_s28 + $0x10] sm:$0xff] %v666_v49  ;;  %v655_v53 = vmul.f32 %v1086_v50, %v603_v31 }
 0x263   : > { %672 = vst [vmem:[%s1456_s28] sm:$0xff] %v664_v51  ;;  %v651_v54 = vmul.f32 %v1088_v52, %v601_v32 }
 0x264   : > { %v667_v55 = vmax.f32 %v655_v53, 0.0 }
 0x265   : > { %v1090_v56 = vpop.eup %1089  ;;  %v665_v57 = vmax.f32 %v651_v54, 0.0 }
 0x266   : > { %v1092_v58 = vpop.eup %1091  ;;  %675 = vst [vmem:[%s1456_s28 + $0x18] sm:$0xff] %v667_v55  ;;  %v659_v59 = vmul.f32 %v1090_v56, %v605_v33 }
 0x267   : > { %673 = vst [vmem:[%s1456_s28 + $0x8] sm:$0xff] %v665_v57  ;;  %v657_v60 = vmul.f32 %v1092_v58, %v604_v34 }
 0x268   : > { %v669_v61 = vmax.f32 %v659_v59, 0.0 }
 0x269   : > { %v1094_v62 = vpop.eup %1093  ;;  %v668_v63 = vmax.f32 %v657_v60, 0.0 }
 0x26a   : > { %v1096_v0 = vpop.eup %1095  ;;  %677 = vst [vmem:[%s1456_s28 + $0x28] sm:$0xff] %v669_v61  ;;  %v663_v1 = vmul.f32 %v1094_v62, %v607_v35 }
 0x26b   : > { %676 = vst [vmem:[%s1456_s28 + $0x20] sm:$0xff] %v668_v63  ;;  %v661_v3 = vmul.f32 %v1096_v0, %v606_v36 }
 0x26c   : > { %v671_v2 = vmax.f32 %v663_v1, 0.0 }
 0x26d   : > { %v670_v4 = vmax.f32 %v661_v3, 0.0 }
 0x26e   : > { %679 = vst [vmem:[%s1456_s28 + $0x38] sm:$0xff] %v671_v2 }
 0x26f   : > { %678 = vst [vmem:[%s1456_s28 + $0x30] sm:$0xff] %v670_v4 }
 0x270 PF: > { %s834_s21 = sshll.u32 %s1237_s22, 10  ;;  %s694_s30 = sshll.u32 %s1456_s28, 4  ;;  %s1591_s30 = int_to_ptr.vmem [resolvable:$true] %s694_s30 }
 0x271   : > { %s1588_s7 = scalar_lea.hbm %s1660_s4, %s834_s21  ;;  %s1595_s27 = scalar_lea.sflag [#allocation4], %s256_s29 }
 0x272   : > { %s1127_s6 = scalar_lea.vmem %s1591_s30, 1024  ;;  %p1682_p1 = scmp.ne.s32.totalorder %s1668_s11, 0 }
 0x273   : > { %p1128_p0 = scmp.ne.s32.totalorder %s1591_s30, %s1127_s6  ;;  %s1258_s22 = smov [#allocation5]  }
 0x274   : > { %s1131_s5 = sshll.u32 %s1258_s22, 4  ;;  %s1132_s5 = int_to_ptr.vmem [resolvable:$false] %s1131_s5 }
 0x275   : > { %p1129_p5 = pnand %p1128_p0, %p1682_p1  ;;  %s1133_s12 = scalar_lea.vmem %s1132_s5, 2048 }
 0x276   : > { %p1134_p3 = scmp.lt.s32.totalorder %s1591_s30, %s1132_s5  ;;  %p1135_p10 = scmp.lt.s32.totalorder %s1133_s12, %s1127_s6 }
 0x277   : > { %p1130_p8 = pneg %p1129_p5 }
 0x278   : > { %p1136_p11 = por %p1135_p10, %p1134_p3 }
 0x27a   : > { %p1137_p6 = pnand %p1136_p11, %p1130_p8 }
 0x27c   : > { %1140 = shalt.err (!%p1137_p6)
}
 0x27d   : > { %s1141_s28 = scalar_lea.hbm %s1588_s7, 1024  ;;  %s1145_s9 = scalar_lea.hbm %s1660_s4, 4096 }
 0x27e   : > { %p1142_p9 = scmp.ne.s32.totalorder %s1588_s7, %s1141_s28  ;;  %p1146_p2 = scmp.lt.u32.totalorder %s1588_s7, %s1660_s4 }
 0x27f   : > { %p1147_p7 = scmp.lt.u32.totalorder %s1145_s9, %s1141_s28  ;;  %p1149_p0 = scmp.lt.u32.totalorder %s1141_s28, %s1588_s7 }
 0x280   : > { %p1143_p13 = pnand %p1142_p9, %p1682_p1 }
 0x281   : > { %p1148_p4 = por %p1147_p7, %p1146_p2 }
 0x282   : > { %p1144_p12 = pneg %p1143_p13 }
 0x283   : > { %p1150_p5 = por %p1149_p0, %p1148_p4 }
 0x285   : > { %p1151_p8 = pnand %p1150_p5, %p1144_p12 }
 0x287   : > { %1154 = shalt.err (!%p1151_p8)
}
 0x288   : > { %s1259_s18 = smov 128   ;;  %s1260_s26 = smov 8  }
 0x289   : > { %953 = dma.vmem_to_hbm [thread:$0]  (%p1682_p1), %s1591_s30, 1024, %s1588_s7, %s1595_s27, %s1259_s18, %s1259_s18, %s1260_s26  }
 0x28a PF: > { %p964_p3 = scmp.ge.s32.totalorder %s1249_s25, 2  ;;  %s709_s6 = sand.u32 1, %s1209_s15  }
 0x28b   : > { %p1683_p10 = scmp.ne.s32.totalorder %s1670_s14, 0  ;;  %s710_s22 = scalar_lea.sflag [#allocation4], %s709_s6 }
 0x28d   : > { %p960_p11 = pnand %p964_p3, %p1683_p10 }
 0x28f   : > { %1204 = dma.done.wait (!%p960_p11), %s710_s22, 1024  }
 0x290   : > { %1206 = vsyncadd (!%p960_p11), %s710_s22, 4294966272  ;;  %s20_s25 = sadd.s32 1, %s1249_s25   ;;  %s1684_s5 = sld [smem:[#allocation10_spill]] }
 0x291   : > { %p17_p6 = scmp.ge.s32.totalorder %s20_s25, 10   ;;  %s1685_s11 = sld [smem:[#allocation8_spill]] }
 0x292   : > { %s1686_s7 = sld [smem:[#allocation9_spill]]  ;;  %s1687_s15 = smov %s1213_s16 }
 0x293   : > { %s1688_s16 = smov %s1217_s17  ;;  %s1690_s18 = smov %s1225_s19 }
 0x294   : > { %s1691_s19 = smov %s1229_s20  ;;  %s1692_s20 = smov %s1376_s13 }
 0x295   : > { %s1693_s21 = smov %s1241_s23  ;;  %s1694_s22 = smov %s1245_s24 }
 0x296   : > { %s1689_s17 = smov %s1684_s5  ;;  %19 = sbr.rel (!%p17_p6) target bundleno = 9 (0x9), region = 96 }
 0x297   : > { %s1695_s23 = smov %s1685_s11 }
 0x298   : > { %s1696_s24 = smov %s1686_s7 }
 0x29d   :  { %715 = vsyncpa [#allocation3], 1 }
 0x29e   :  { %717 = vsyncpa [#allocation3 + $0x1], 1 }
 0x29f   :  { %718 = vsyncpa [#allocation4], 1 }
 0x2a0   :  { %720 = vsyncpa [#allocation4 + $0x1], 1 }

</bundles_post_ra>
